<compile_context>
chip_gen: v7x
topology: tpu7x:2x2x1
jax: 0.10.0
libtpu: 0.0.40
codegen_flags: <defaults>
</compile_context>

<pallas_src>
import jax
import jax.numpy as jnp
from jax.experimental import pallas as pl
from jax.experimental.pallas import tpu as pltpu


def _decoder_kernel(tok_ref,            # [1, B, 1] int32  this step's token ids
                    h0_ref,             # [B, H]           initial hidden
                    emb_ref,            # [V, E]           embedding table
                    wx_ref,             # [E, 4H+O]        x -> [ r | z | i_n | 0 | W_out_e ]
                    wh_ref,             # [H, 4H+O]        h -> [ r | z | 0 | h_n | 0 ]
                    bg_ref,             # [1, 4H+O]        fused biases (incl. b_out)
                    woh_ref,            # [H, O]           h_new -> logits
                    probs_ref,          # [1, B, O]  out   per-step probabilities
                    hlast_ref,          # [B, H]     out   final hidden (last step only)
                    h_state):           # [B, H]   VMEM scratch: carried hidden state
    t = pl.program_id(0)
    B, H = h_state.shape
    V = emb_ref.shape[0]
    O = probs_ref.shape[-1]

    @pl.when(t == 0)
    def _():
        h_state[...] = h0_ref[...]

    h = h_state[...]

    # ---- Embedding gather as a one-hot MXU matmul ([B,V] @ [V,E]) ----
    # Out-of-range token ids produce an all-zero one-hot row (no OOB VMEM read).
    tok = tok_ref[0]                                                 # [B, 1] int32
    onehot = (tok == jax.lax.broadcasted_iota(jnp.int32, (B, V), 1)
              ).astype(jnp.float32)                                  # [B, V]
    x = jnp.dot(onehot, emb_ref[...], preferred_element_type=jnp.float32)   # [B, E]
    # TODO(synk): training-mode nn.Dropout(keep_prob) not implemented (eval identity).

    # ---- Fused gate + x-half-of-output-projection matmul (kept in vregs) ----
    # g columns: [ r | z | i_n | h_n | x@W_out_e + b_out ]   (4H + O wide)
    g = (jnp.dot(x, wx_ref[...], preferred_element_type=jnp.float32)
         + jnp.dot(h, wh_ref[...], preferred_element_type=jnp.float32)
         + bg_ref[...])

    r = jax.nn.sigmoid(g[:, 0:H])
    z = jax.nn.sigmoid(g[:, H:2 * H])
    n = jnp.tanh(g[:, 2 * H:3 * H] + r * g[:, 3 * H:4 * H])
    h_new = (1.0 - z) * n + z * h
    h_state[...] = h_new

    # ---- Output projection: only the h_new-dependent K=32 matmul remains ----
    logits = g[:, 4 * H:4 * H + O] + jnp.dot(h_new, woh_ref[...],
                                             preferred_element_type=jnp.float32)

    # Numerically stable softmax; approx reciprocal (EUP) + one Newton step.
    m = jnp.max(logits, axis=1, keepdims=True)
    e = jnp.exp(logits - m)
    s = jnp.sum(e, axis=1, keepdims=True)
    inv = pl.reciprocal(s, approx=True)
    inv = inv * (2.0 - s * inv)                       # Newton refine for 1e-5 tol
    probs_ref[0] = (e * inv).astype(probs_ref.dtype)

    @pl.when(t == pl.num_programs(0) - 1)
    def _():
        hlast_ref[...] = h_new.astype(hlast_ref.dtype)


def response_decoder_decode(token_seq, h0, embedding_table, fused):
    """T fused decode steps (token ids given per step).

    token_seq: [T, B] int32, h0: [B, H] f32 -> (probs [T, B, O], h_last [B, H]).
    """
    T, B = token_seq.shape
    V, E = embedding_table.shape
    H = h0.shape[1]
    G = fused["w_x"].shape[1]                     # 4H + O
    O = fused["w_out_h"].shape[1]

    tok3 = token_seq.reshape(T, B, 1).astype(jnp.int32)

    flops = T * 2 * B * (V * E + E * G + H * G + H * O)
    bytes_accessed = 4 * (embedding_table.size + h0.size + fused["w_x"].size
                          + fused["w_h"].size + fused["b_gates"].size
                          + fused["w_out_h"].size
                          + T * B + T * B * O + B * H)
    cost = pl.CostEstimate(flops=flops,
                           transcendentals=T * B * (3 * H + O),
                           bytes_accessed=bytes_accessed)

    # NOTE: at these toy sizes the table (V*E*4 = 16 KB) trivially fits VMEM on
    # v5e/v6e/v7x.  For realistic vocabularies keep the table in pl.ANY/HBM and
    # DMA only the B needed rows per step (driven by scalar-prefetched ids).
    probs, h_last = pl.pallas_call(
        _decoder_kernel,
        out_shape=(jax.ShapeDtypeStruct((T, B, O), jnp.float32),
                   jax.ShapeDtypeStruct((B, H), jnp.float32)),
        grid_spec=pltpu.PrefetchScalarGridSpec(
            num_scalar_prefetch=0,
            grid=(T,),
            in_specs=[
                pl.BlockSpec((1, B, 1), lambda t: (t, 0, 0)),   # per-step tokens
                pl.BlockSpec((B, H), lambda t: (0, 0)),         # h0 (constant -> DMA once)
                pl.BlockSpec((V, E), lambda t: (0, 0)),         # embedding table
                pl.BlockSpec((E, G), lambda t: (0, 0)),         # fused x-gate weights
                pl.BlockSpec((H, G), lambda t: (0, 0)),         # fused h-gate weights
                pl.BlockSpec((1, G), lambda t: (0, 0)),         # fused biases
                pl.BlockSpec((H, O), lambda t: (0, 0)),         # output projection (h part)
            ],
            out_specs=(
                pl.BlockSpec((1, B, O), lambda t: (t, 0, 0)),   # lane-dense probs
                pl.BlockSpec((B, H), lambda t: (0, 0)),         # final hidden (written once)
            ),
            scratch_shapes=[pltpu.VMEM((B, H), jnp.float32)],
        ),
        compiler_params=pltpu.CompilerParams(
            # Sequential hidden-state carry across steps -> "arbitrary".
            # TODO(synk): for v7x (2 TCs) add a parallel batch grid axis once the
            # batch is big enough to split across cores.
            dimension_semantics=("arbitrary",)),
        cost_estimate=cost,
    )(tok3, h0, embedding_table, fused["w_x"], fused["w_h"],
      fused["b_gates"], fused["w_out_h"])
    return probs, h_last


def response_decoder_forward(token_ids, pre_hidden, embedding_table, fused):
    """Single decode step == the PyTorch module forward.

    token_ids: [B, 1] int32, pre_hidden: [B, 1, H] -> (probs [B, O], hidden [B, 1, H]).
    """
    probs_seq, h_last = response_decoder_decode(token_ids[:, 0][None, :],
                                                pre_hidden[:, 0, :],
                                                embedding_table, fused)
    return probs_seq[0], h_last[:, None, :]


# ----------------------------------------------------------------------------
# Parameter construction (raw PyTorch-like params + fused kernel layout).
# ----------------------------------------------------------------------------
def make_raw_params(key, embedding_size, hidden_size, output_size):
    """Raw params, stored [in, out] (transposed from PyTorch), gate order r,z,n."""
    E, H, O = embedding_size, hidden_size, output_size
    ks = jax.random.split(key, 7)
    s = 0.1
    return dict(
        w_ih=s * jax.random.normal(ks[0], (E, 3 * H), jnp.float32),
        w_hh=s * jax.random.normal(ks[1], (H, 3 * H), jnp.float32),
        b_ih=s * jax.random.normal(ks[2], (1, 3 * H), jnp.float32),
        b_hh=s * jax.random.normal(ks[3], (1, 3 * H), jnp.float32),
        w_out_e=s * jax.random.normal(ks[4], (E, O), jnp.float32),   # nn.Linear(H+E, O),
        w_out_h=s * jax.random.normal(ks[5], (H, O), jnp.float32),   # concat order (emb, h)
        b_out=s * jax.random.normal(ks[6], (1, O), jnp.float32),
    )


def fuse_params(raw):
    """Pack raw params into the fused single-pass layouts used by the kernel."""
    E = raw["w_ih"].shape[0]
    H = raw["w_hh"].shape[0]
    O = raw["b_out"].shape[-1]
    w_ih, w_hh = raw["w_ih"], raw["w_hh"]
    b_ih, b_hh = raw["b_ih"], raw["b_hh"]
    # Gate + output columns: [ r | z | i_n | h_n | out_x ]   (4H + O wide)
    w_x = jnp.concatenate([w_ih[:, 0:H], w_ih[:, H:2 * H], w_ih[:, 2 * H:3 * H],
                           jnp.zeros((E, H), jnp.float32), raw["w_out_e"]], axis=1)
    w_h = jnp.concatenate([w_hh[:, 0:H], w_hh[:, H:2 * H],
                           jnp.zeros((H, H), jnp.float32), w_hh[:, 2 * H:3 * H],
                           jnp.zeros((H, O), jnp.float32)], axis=1)
    b_gates = jnp.concatenate([b_ih[:, 0:H] + b_hh[:, 0:H],
                               b_ih[:, H:2 * H] + b_hh[:, H:2 * H],
                               b_ih[:, 2 * H:3 * H], b_hh[:, 2 * H:3 * H],
                               raw["b_out"]], axis=1)
    return dict(w_x=w_x, w_h=w_h, b_gates=b_gates, w_out_h=raw["w_out_h"])


# ----------------------------------------------------------------------------
# Pure-JAX references (unfused params).
# ----------------------------------------------------------------------------
def _reference_forward(token_ids, pre_hidden, embedding_table, p):
    x = jnp.take(embedding_table, token_ids[:, 0], axis=0)
    h = pre_hidden[:, 0, :]
    H = h.shape[1]
    gi = x @ p["w_ih"] + p["b_ih"]
    gh = h @ p["w_hh"] + p["b_hh"]
    r = jax.nn.sigmoid(gi[:, :H] + gh[:, :H])
    z = jax.nn.sigmoid(gi[:, H:2 * H] + gh[:, H:2 * H])
    n = jnp.tanh(gi[:, 2 * H:] + r * gh[:, 2 * H:])
    h_new = (1 - z) * n + z * h
    logits = x @ p["w_out_e"] + h_new @ p["w_out_h"] + p["b_out"]
    return jax.nn.softmax(logits, axis=1), h_new[:, None, :]


def _reference_decode(token_seq, h0, embedding_table, p):
    h = h0[:, None, :]
    probs = []
    for t in range(token_seq.shape[0]):
        pr, h = _reference_forward(token_seq[t][:, None], h, embedding_table, p)
        probs.append(pr)
    return jnp.stack(probs, axis=0), h[:, 0, :]


if __name__ == "__main__":
    B, E, H, O, V, T = 8, 32, 32, 128, 128, 6   # batch, emb, hidden, vocab-out, table rows, steps

    key = jax.random.PRNGKey(0)
    k_emb, k_par, k_tok, k_hid, k_seq = jax.random.split(key, 5)

    embedding_table = 0.1 * jax.random.normal(k_emb, (V, E), jnp.float32)
    raw_params = make_raw_params(k_par, E, H, O)
    fused_params = fuse_params(raw_params)

    # ---- Single step: exact module-forward semantics ----
    token_ids = jax.random.randint(k_tok, (B, 1), 0, V, dtype=jnp.int32)   # [B, 1]
    pre_hidden = 0.1 * jax.random.normal(k_hid, (B, 1, H), jnp.float32)    # [B, 1, H]

    probs, hidden = response_decoder_forward(token_ids, pre_hidden,
                                             embedding_table, fused_params)
    probs = jax.block_until_ready(probs)
    hidden = jax.block_until_ready(hidden)

    ref_probs, ref_hidden = _reference_forward(token_ids, pre_hidden,
                                               embedding_table, raw_params)
    assert probs.shape == (B, O) and hidden.shape == (B, 1, H)
    assert jnp.allclose(probs, ref_probs, atol=1e-5, rtol=1e-5)
    assert jnp.allclose(hidden, ref_hidden, atol=1e-5, rtol=1e-5)
    assert jnp.allclose(jnp.sum(probs, axis=1), 1.0, atol=1e-5)

    # ---- Multi-step fused decode (grid=(T,), weights DMA'd once) ----
    token_seq = jax.random.randint(k_seq, (T, B), 0, V, dtype=jnp.int32)   # [T, B]
    h0 = pre_hidden[:, 0, :]
    probs_seq, h_last = response_decoder_decode(token_seq, h0,
                                                embedding_table, fused_params)
    probs_seq = jax.block_until_ready(probs_seq)
    h_last = jax.block_until_ready(h_last)

    ref_seq, ref_hlast = _reference_decode(token_seq, h0, embedding_table, raw_params)
    assert probs_seq.shape == (T, B, O) and h_last.shape == (B, H)
    assert jnp.allclose(probs_seq, ref_seq, atol=5e-5, rtol=1e-4)
    assert jnp.allclose(h_last, ref_hlast, atol=5e-5, rtol=1e-4)

    print("KERNEL_OK")
</pallas_src>

<mosaic_0001>
module attributes {stable_mosaic.version = 11 : i64} {
  func.func @_decoder_kernel(%arg0: i32, %arg1: memref<1x8x1xi32, #tpu.memory_space<vmem>>, %arg2: memref<8x32xf32, #tpu.memory_space<vmem>>, %arg3: memref<128x32xf32, #tpu.memory_space<vmem>>, %arg4: memref<32x256xf32, #tpu.memory_space<vmem>>, %arg5: memref<32x256xf32, #tpu.memory_space<vmem>>, %arg6: memref<1x256xf32, #tpu.memory_space<vmem>>, %arg7: memref<32x128xf32, #tpu.memory_space<vmem>>, %arg8: memref<1x8x128xf32, #tpu.memory_space<vmem>>, %arg9: memref<8x32xf32, #tpu.memory_space<vmem>>, %arg10: memref<8x32xf32, #tpu.memory_space<vmem>>) attributes {dimension_semantics = [#tpu.dimension_semantics<arbitrary>], iteration_bounds = array<i64: 1>, scalar_prefetch = 0 : i64, scratch_operands = 1 : i64, tpu.core_type = #tpu.core_type<tc>, window_params = [{transform_indices = @transform_0, window_bounds = array<i64: 1, 8, 1>}, {pipeline_mode = #tpu.pipeline_mode<synchronous>, transform_indices = @transform_1, window_bounds = array<i64: 8, 32>}, {pipeline_mode = #tpu.pipeline_mode<synchronous>, transform_indices = @transform_2, window_bounds = array<i64: 128, 32>}, {pipeline_mode = #tpu.pipeline_mode<synchronous>, transform_indices = @transform_3, window_bounds = array<i64: 32, 256>}, {pipeline_mode = #tpu.pipeline_mode<synchronous>, transform_indices = @transform_4, window_bounds = array<i64: 32, 256>}, {pipeline_mode = #tpu.pipeline_mode<synchronous>, transform_indices = @transform_5, window_bounds = array<i64: 1, 256>}, {pipeline_mode = #tpu.pipeline_mode<synchronous>, transform_indices = @transform_6, window_bounds = array<i64: 32, 128>}, {transform_indices = @transform_7, window_bounds = array<i64: 1, 8, 128>}, {pipeline_mode = #tpu.pipeline_mode<synchronous>, transform_indices = @transform_8, window_bounds = array<i64: 8, 32>}]} {
    %c0_i32 = arith.constant 0 : i32
    %0 = arith.cmpi eq, %arg0, %c0_i32 : i32
    %1 = arith.extui %0 : i1 to i32
    %c0_i32_0 = arith.constant 0 : i32
    %2 = arith.cmpi ne, %1, %c0_i32_0 : i32
    scf.if %2 {
      %c0_31 = arith.constant 0 : index
      %c0_32 = arith.constant 0 : index
      %68 = vector.load %arg2[%c0_31, %c0_32] : memref<8x32xf32, #tpu.memory_space<vmem>>, vector<8x32xf32>
      %c0_33 = arith.constant 0 : index
      %c0_34 = arith.constant 0 : index
      %69 = vector.load %arg10[%c0_33, %c0_34] : memref<8x32xf32, #tpu.memory_space<vmem>>, vector<8x32xf32>
      tpu.vector_store %arg10[%c0_33, %c0_34], %68 {strides = array<i32>} : memref<8x32xf32, #tpu.memory_space<vmem>>, vector<8x32xf32>,
    } else {
    }
    %c0 = arith.constant 0 : index
    %c0_1 = arith.constant 0 : index
    %3 = vector.load %arg10[%c0, %c0_1] : memref<8x32xf32, #tpu.memory_space<vmem>>, vector<8x32xf32>
    %c0_2 = arith.constant 0 : index
    %c0_3 = arith.constant 0 : index
    %c0_4 = arith.constant 0 : index
    %4 = vector.load %arg1[%c0_2, %c0_3, %c0_4] : memref<1x8x1xi32, #tpu.memory_space<vmem>>, vector<1x8x1xi32>
    %5 = vector.shape_cast %4 : vector<1x8x1xi32> to vector<8x1xi32>
    %6 = tpu.iota {dimensions = array<i32: 1>} : vector<8x128xi32>
    %7 = vector.broadcast %5 : vector<8x1xi32> to vector<8x128xi32>
    %8 = arith.cmpi eq, %7, %6 : vector<8x128xi32>
    %9 = arith.extui %8 : vector<8x128xi1> to vector<8x128xi32>
    %10 = arith.sitofp %9 : vector<8x128xi32> to vector<8x128xf32>
    %c0_5 = arith.constant 0 : index
    %c0_6 = arith.constant 0 : index
    %11 = vector.load %arg3[%c0_5, %c0_6] : memref<128x32xf32, #tpu.memory_space<vmem>>, vector<128x32xf32>
    %cst = arith.constant dense<0.000000e+00> : vector<8x32xf32>
    %12 = tpu.matmul %10, %11, %cst {dimension_numbers = #tpu.dot_dimension_numbers<[1], [0], [0], [1], [0, 0, 1, 1], [], []>} : vector<8x128xf32>, vector<128x32xf32>, vector<8x32xf32> -> vector<8x32xf32>
    %c0_7 = arith.constant 0 : index
    %c0_8 = arith.constant 0 : index
    %13 = vector.load %arg4[%c0_7, %c0_8] : memref<32x256xf32, #tpu.memory_space<vmem>>, vector<32x256xf32>
    %cst_9 = arith.constant dense<0.000000e+00> : vector<8x256xf32>
    %14 = tpu.matmul %12, %13, %cst_9 {dimension_numbers = #tpu.dot_dimension_numbers<[1], [0], [0], [1], [0, 0, 1, 1], [], []>} : vector<8x32xf32>, vector<32x256xf32>, vector<8x256xf32> -> vector<8x256xf32>
    %c0_10 = arith.constant 0 : index
    %c0_11 = arith.constant 0 : index
    %15 = vector.load %arg5[%c0_10, %c0_11] : memref<32x256xf32, #tpu.memory_space<vmem>>, vector<32x256xf32>
    %cst_12 = arith.constant dense<0.000000e+00> : vector<8x256xf32>
    %16 = tpu.matmul %3, %15, %cst_12 {dimension_numbers = #tpu.dot_dimension_numbers<[1], [0], [0], [1], [0, 0, 1, 1], [], []>} : vector<8x32xf32>, vector<32x256xf32>, vector<8x256xf32> -> vector<8x256xf32>
    %17 = arith.addf %14, %16 : vector<8x256xf32>
    %c0_13 = arith.constant 0 : index
    %c0_14 = arith.constant 0 : index
    %18 = vector.load %arg6[%c0_13, %c0_14] : memref<1x256xf32, #tpu.memory_space<vmem>>, vector<1x256xf32>
    %19 = vector.broadcast %18 : vector<1x256xf32> to vector<8x256xf32>
    %20 = arith.addf %17, %19 : vector<8x256xf32>
    %21 = vector.extract_strided_slice %20 {offsets = [0, 0], sizes = [8, 32], strides = [1, 1]} : vector<8x256xf32> to vector<8x32xf32>
    %22 = arith.negf %21 : vector<8x32xf32>
    %23 = math.exp %22 : vector<8x32xf32>
    %cst_15 = arith.constant 1.000000e+00 : f32
    %24 = vector.broadcast %cst_15 : f32 to vector<8x32xf32>
    %25 = arith.addf %24, %23 : vector<8x32xf32>
    %26 = arith.divf %24, %25 : vector<8x32xf32>
    %27 = vector.extract_strided_slice %20 {offsets = [0, 32], sizes = [8, 32], strides = [1, 1]} : vector<8x256xf32> to vector<8x32xf32>
    %28 = arith.negf %27 : vector<8x32xf32>
    %29 = math.exp %28 : vector<8x32xf32>
    %cst_16 = arith.constant 1.000000e+00 : f32
    %30 = vector.broadcast %cst_16 : f32 to vector<8x32xf32>
    %31 = arith.addf %30, %29 : vector<8x32xf32>
    %32 = arith.divf %30, %31 : vector<8x32xf32>
    %33 = vector.extract_strided_slice %20 {offsets = [0, 64], sizes = [8, 32], strides = [1, 1]} : vector<8x256xf32> to vector<8x32xf32>
    %34 = vector.extract_strided_slice %20 {offsets = [0, 96], sizes = [8, 32], strides = [1, 1]} : vector<8x256xf32> to vector<8x32xf32>
    %35 = arith.mulf %26, %34 : vector<8x32xf32>
    %36 = arith.addf %33, %35 : vector<8x32xf32>
    %37 = math.tanh %36 : vector<8x32xf32>
    %cst_17 = arith.constant 1.000000e+00 : f32
    %38 = vector.broadcast %cst_17 : f32 to vector<8x32xf32>
    %39 = arith.subf %38, %32 : vector<8x32xf32>
    %40 = arith.mulf %39, %37 : vector<8x32xf32>
    %41 = arith.mulf %32, %3 : vector<8x32xf32>
    %42 = arith.addf %40, %41 : vector<8x32xf32>
    %c0_18 = arith.constant 0 : index
    %c0_19 = arith.constant 0 : index
    %43 = vector.load %arg10[%c0_18, %c0_19] : memref<8x32xf32, #tpu.memory_space<vmem>>, vector<8x32xf32>
    tpu.vector_store %arg10[%c0_18, %c0_19], %42 {strides = array<i32>} : memref<8x32xf32, #tpu.memory_space<vmem>>, vector<8x32xf32>,
    %44 = vector.extract_strided_slice %20 {offsets = [0, 128], sizes = [8, 128], strides = [1, 1]} : vector<8x256xf32> to vector<8x128xf32>
    %c0_20 = arith.constant 0 : index
    %c0_21 = arith.constant 0 : index
    %45 = vector.load %arg7[%c0_20, %c0_21] : memref<32x128xf32, #tpu.memory_space<vmem>>, vector<32x128xf32>
    %cst_22 = arith.constant dense<0.000000e+00> : vector<8x128xf32>
    %46 = tpu.matmul %42, %45, %cst_22 {dimension_numbers = #tpu.dot_dimension_numbers<[1], [0], [0], [1], [0, 0, 1, 1], [], []>} : vector<8x32xf32>, vector<32x128xf32>, vector<8x128xf32> -> vector<8x128xf32>
    %47 = arith.addf %44, %46 : vector<8x128xf32>
    %cst_23 = arith.constant dense<0xFF800000> : vector<8xf32>
    %48 = vector.multi_reduction <maximumf>, %47, %cst_23 [1] : vector<8x128xf32> to vector<8xf32>
    %49 = vector.shape_cast %48 : vector<8xf32> to vector<8x1xf32>
    %50 = vector.broadcast %49 : vector<8x1xf32> to vector<8x128xf32>
    %51 = arith.subf %47, %50 : vector<8x128xf32>
    %52 = math.exp %51 : vector<8x128xf32>
    %cst_24 = arith.constant dense<0.000000e+00> : vector<8xf32>
    %53 = vector.multi_reduction <add>, %52, %cst_24 [1] : vector<8x128xf32> to vector<8xf32>
    %54 = vector.shape_cast %53 : vector<8xf32> to vector<8x1xf32>
    %55 = tpu.reciprocal %54 {approx = true} : vector<8x1xf32> -> vector<8x1xf32>
    %56 = arith.mulf %54, %55 : vector<8x1xf32>
    %cst_25 = arith.constant 2.000000e+00 : f32
    %57 = vector.broadcast %cst_25 : f32 to vector<8x1xf32>
    %58 = arith.subf %57, %56 : vector<8x1xf32>
    %59 = arith.mulf %55, %58 : vector<8x1xf32>
    %60 = vector.broadcast %59 : vector<8x1xf32> to vector<8x128xf32>
    %61 = arith.mulf %52, %60 : vector<8x128xf32>
    %c0_26 = arith.constant 0 : index
    %c0_27 = arith.constant 0 : index
    %c0_28 = arith.constant 0 : index
    %62 = vector.load %arg8[%c0_26, %c0_27, %c0_28] : memref<1x8x128xf32, #tpu.memory_space<vmem>>, vector<1x8x128xf32>
    %63 = vector.shape_cast %62 : vector<1x8x128xf32> to vector<8x128xf32>
    %64 = vector.shape_cast %61 : vector<8x128xf32> to vector<1x8x128xf32>
    tpu.vector_store %arg8[%c0_26, %c0_27, %c0_28], %64 {strides = array<i32>} : memref<1x8x128xf32, #tpu.memory_space<vmem>>, vector<1x8x128xf32>,
    %c0_i32_29 = arith.constant 0 : i32
    %65 = arith.cmpi eq, %arg0, %c0_i32_29 : i32
    %66 = arith.extui %65 : i1 to i32
    %c0_i32_30 = arith.constant 0 : i32
    %67 = arith.cmpi ne, %66, %c0_i32_30 : i32
    scf.if %67 {
      %c0_31 = arith.constant 0 : index
      %c0_32 = arith.constant 0 : index
      %68 = vector.load %arg9[%c0_31, %c0_32] : memref<8x32xf32, #tpu.memory_space<vmem>>, vector<8x32xf32>
      tpu.vector_store %arg9[%c0_31, %c0_32], %42 {strides = array<i32>} : memref<8x32xf32, #tpu.memory_space<vmem>>, vector<8x32xf32>,
    } else {
    }
    return
  }
  func.func @transform_0(%arg0: i32) -> (i32, i32, i32) {
    %c0_i32 = arith.constant 0 : i32
    %c0_i32_0 = arith.constant 0 : i32
    %c0_i32_1 = arith.constant 0 : i32
    return %arg0, %c0_i32, %c0_i32_0 : i32, i32, i32
  }
  func.func @transform_1(%arg0: i32) -> (i32, i32) {
    %c0_i32 = arith.constant 0 : i32
    %c0_i32_0 = arith.constant 0 : i32
    %c0_i32_1 = arith.constant 0 : i32
    return %c0_i32, %c0_i32_0 : i32, i32
  }
  func.func @transform_2(%arg0: i32) -> (i32, i32) {
    %c0_i32 = arith.constant 0 : i32
    %c0_i32_0 = arith.constant 0 : i32
    %c0_i32_1 = arith.constant 0 : i32
    return %c0_i32, %c0_i32_0 : i32, i32
  }
  func.func @transform_3(%arg0: i32) -> (i32, i32) {
    %c0_i32 = arith.constant 0 : i32
    %c0_i32_0 = arith.constant 0 : i32
    %c0_i32_1 = arith.constant 0 : i32
    return %c0_i32, %c0_i32_0 : i32, i32
  }
  func.func @transform_4(%arg0: i32) -> (i32, i32) {
    %c0_i32 = arith.constant 0 : i32
    %c0_i32_0 = arith.constant 0 : i32
    %c0_i32_1 = arith.constant 0 : i32
    return %c0_i32, %c0_i32_0 : i32, i32
  }
  func.func @transform_5(%arg0: i32) -> (i32, i32) {
    %c0_i32 = arith.constant 0 : i32
    %c0_i32_0 = arith.constant 0 : i32
    %c0_i32_1 = arith.constant 0 : i32
    return %c0_i32, %c0_i32_0 : i32, i32
  }
  func.func @transform_6(%arg0: i32) -> (i32, i32) {
    %c0_i32 = arith.constant 0 : i32
    %c0_i32_0 = arith.constant 0 : i32
    %c0_i32_1 = arith.constant 0 : i32
    return %c0_i32, %c0_i32_0 : i32, i32
  }
  func.func @transform_7(%arg0: i32) -> (i32, i32, i32) {
    %c0_i32 = arith.constant 0 : i32
    %c0_i32_0 = arith.constant 0 : i32
    %c0_i32_1 = arith.constant 0 : i32
    return %arg0, %c0_i32, %c0_i32_0 : i32, i32, i32
  }
  func.func @transform_8(%arg0: i32) -> (i32, i32) {
    %c0_i32 = arith.constant 0 : i32
    %c0_i32_0 = arith.constant 0 : i32
    %c0_i32_1 = arith.constant 0 : i32
    return %c0_i32, %c0_i32_0 : i32, i32
  }
}

</mosaic_0001>

<bundles_post_ra>
// kernel: tpu_custom_call.1
= control target key start
LH: loop header
LB: loop body
LE: loop exit
PB: predicated region body
PF: predicated region fallthrough
CT: control target
= control target key end

     0   :  { %14 = vsyncpa [#allocation4], 0  ;;  %v658_v3 = vmov 0   ;;  %v659_v4 = vmov 0.0|0.0   ;;  %vm660_vm0 = vmmov 0   ;;  %v661_v8 = vmov 0.0   ;;  %s876_s0 = inlined_call_operand.vmem [shape: s32[1,8,1], index: 0, kind: input, shape index: {}]   ;;  %s877_s1 = inlined_call_operand.vmem [shape: f32[8,32], index: 1, kind: input, shape index: {}]   ;;  %s878_s2 = inlined_call_operand.vmem [shape: f32[128,32], index: 2, kind: input, shape index: {}]   ;;  %s879_s3 = inlined_call_operand.vmem [shape: f32[32,256], index: 3, kind: input, shape index: {}]   ;;  %s880_s4 = inlined_call_operand.vmem [shape: f32[32,256], index: 4, kind: input, shape index: {}]   ;;  %s881_s5 = inlined_call_operand.vmem [shape: f32[1,256], index: 5, kind: input, shape index: {}]   ;;  %s882_s6 = inlined_call_operand.vmem [shape: f32[32,128], index: 6, kind: input, shape index: {}]   ;;  %s883_s7 = inlined_call_operand.hbm [shape: f32[1,8,128], index: 7, kind: output, shape index: {0}]   ;;  %s884_s8 = inlined_call_operand.hbm [shape: f32[8,32], index: 8, kind: output, shape index: {1}]  }
   0x1   :  { %v38_v0 = vld [vmem:[%s876_s0] sm:$0xff]  ;;  %v48_v2 = vld [vmem:[%s878_s2 + $0x8] sm:$0xff]  ;;  %599 = vset.pattern.permute.xlu0 %v658_v3  ;;  %541 = vmatprep.subr.bf16.mxu0 %v659_v4  ;;  %v49_v6 = vld [vmem:[%s878_s2 + $0x10] sm:$0xff]  ;;  %vm35_vm1 = vcmask 261120  }
   0x2   :  { %v47_v1 = vld [vmem:[%s878_s2] sm:$0xff]  ;;  %v50_v7 = vld [vmem:[%s878_s2 + $0x18] sm:$0xff]  ;;  %42 = vperm.xlu0 %599, %v38_v0   ;;  %527 = vmatprep.mubr.msk.f32.mxu0 %vm660_vm0, %v661_v8  ;;  %v52_v11 = vld [vmem:[%s878_s2 + $0x28] sm:$0xff] }
   0x3   :  { %v542_v5 = vpack.c.bf16 %v48_v2, %v47_v1  ;;  %v545_v9 = vpack.c.bf16 %v50_v7, %v49_v6  ;;  %217 = vmatprep.mubr.f32.mxu1 %v661_v8  ;;  %v51_v10 = vld [vmem:[%s878_s2 + $0x20] sm:$0xff]  ;;  %v142_v12 = vld [vmem:[%s880_s4 + $0x8] sm:$0xff]  ;;  %v53_v13 = vld [vmem:[%s878_s2 + $0x30] sm:$0xff] }
   0x4   :  { %v54_v14 = vld [vmem:[%s878_s2 + $0x38] sm:$0xff]  ;;  %v141_v16 = vld [vmem:[%s880_s4] sm:$0xff]  ;;  %v143_v17 = vld [vmem:[%s880_s4 + $0x10] sm:$0xff]  ;;  %v548_v18 = vpack.c.bf16 %v52_v11, %v51_v10 }
   0x5   :  { %543 = vmatpush3.bf16.msra.mxu0 %v542_v5  ;;  %v144_v15 = vld [vmem:[%s880_s4 + $0x18] sm:$0xff]  ;;  %v567_v20 = vpack.c.bf16 %v143_v17, %v141_v16  ;;  %v146_v21 = vld [vmem:[%s880_s4 + $0x28] sm:$0xff]  ;;  %v145_v23 = vld [vmem:[%s880_s4 + $0x20] sm:$0xff]  ;;  %v551_v30 = vpack.c.bf16 %v54_v14, %v53_v13 }
   0x6   :  { %544 = vmatprep.subr.bf16.mxu0 %v659_v4  ;;  %v565_v19 = vpack.c.bf16 %v144_v15, %v142_v12  ;;  %v148_v22 = vld [vmem:[%s880_s4 + $0x38] sm:$0xff]  ;;  %v147_v25 = vld [vmem:[%s880_s4 + $0x30] sm:$0xff]  ;;  %v134_v26 = vld [vmem:[%s879_s3 + $0x8] sm:$0xff] }
   0x7   :  { %v569_v24 = vpack.c.bf16 %v148_v22, %v146_v21  ;;  %v136_v27 = vld [vmem:[%s879_s3 + $0x18] sm:$0xff]  ;;  %v34_v28 = vld [vmem:[%s877_s1] sm:$0xff]  ;;  %v571_v29 = vpack.c.bf16 %v147_v25, %v145_v23 }
   0x8   :  { %566 = vmatprep.subr.bf16.mxu1 %v565_v19  ;;  %36 = vst.msk [vmem:[#allocation2] sm:$0xff] %vm35_vm1, %v34_v28  ;;  %v55_v31 = vld [vmem:[%s878_s2 + $0x40] sm:$0xff]  ;;  %v573_v32 = vpack.c.bf16 %v136_v27, %v134_v26 }
   0x9   :  { %546 = vmatpush3.bf16.msra.mxu0 %v545_v9  ;;  %568 = vmatpush1.bf16.msra.mxu1 %v567_v20 }
   0xa   :  { %547 = vmatprep.subr.bf16.mxu0 %v659_v4  ;;  %570 = vmatprep.subr.bf16.mxu1 %v569_v24 }
   0xd   :  { %549 = vmatpush3.bf16.msra.mxu0 %v548_v18 }
   0xe   :  { %15 = vsyncpa [#allocation6], 0  ;;  %550 = vmatprep.subr.bf16.mxu0 %v659_v4  ;;  %v56_v33 = vld [vmem:[%s878_s2 + $0x48] sm:$0xff]  ;;  %v133_v34 = vld [vmem:[%s879_s3] sm:$0xff]  ;;  %572 = vmatpush1.bf16.msra.mxu1 %v571_v29  ;;  %v39_v54 = vlaneseq  ;;  %v662_v57 = vmov 1.0   ;;  %s663_s23 = smov 32  }
   0xf   :  { %v135_v35 = vld [vmem:[%s879_s3 + $0x10] sm:$0xff]  ;;  %v138_v36 = vld [vmem:[%s879_s3 + $0x28] sm:$0xff]  ;;  %v140_v37 = vld [vmem:[%s879_s3 + $0x38] sm:$0xff]  ;;  %v554_v38 = vpack.c.bf16 %v56_v33, %v55_v31  ;;  %574 = vmatprep.subr.bf16.mxu1 %v573_v32  ;;  %s665_s9 = smov 96  }
  0x10   :  { %v57_v39 = vld [vmem:[%s878_s2 + $0x50] sm:$0xff]  ;;  %v575_v40 = vpack.c.bf16 %v135_v35, %v133_v34  ;;  %v58_v41 = vld [vmem:[%s878_s2 + $0x58] sm:$0xff]  ;;  %v577_v42 = vpack.c.bf16 %v140_v37, %v138_v36  ;;  %v137_v43 = vld [vmem:[%s879_s3 + $0x20] sm:$0xff]  ;;  %v40_v55 = vand.u32 127, %v39_v54  ;;  %v301_v60 = vshrl.u32 %v39_v54, 7 }
  0x11   :  { %552 = vmatpush3.bf16.msra.mxu0 %v551_v30  ;;  %v139_v44 = vld [vmem:[%s879_s3 + $0x30] sm:$0xff]  ;;  %v37_v45 = vld [vmem:[#allocation2] sm:$0xff]  ;;  %v557_v46 = vpack.c.bf16 %v58_v41, %v57_v39  ;;  %v59_v48 = vld [vmem:[%s878_s2 + $0x60] sm:$0xff] }
  0x12   :  { %553 = vmatprep.subr.bf16.mxu0 %v659_v4  ;;  %469 = vmatmul.mubr.msk.f32.vlgmr.msra.gmra.mrb[0].mxu1 %vm35_vm1, %v37_v45  ;;  %v579_v47 = vpack.c.bf16 %v139_v44, %v137_v43  ;;  %v60_v49 = vld [vmem:[%s878_s2 + $0x68] sm:$0xff]  ;;  %v61_v51 = vld [vmem:[%s878_s2 + $0x70] sm:$0xff]  ;;  %v62_v52 = vld [vmem:[%s878_s2 + $0x78] sm:$0xff]  ;;  %v306_v62 = vsub.s32 1, %v301_v60  ;;  %v302_v0 = vsub.s32 0, %v301_v60 }
  0x13   :  { %576 = vmatpush1.bf16.msra.mxu1 %v575_v40  ;;  %291 = vmatprep.mubr.f32.mxu1 %v661_v8  ;;  %v560_v50 = vpack.c.bf16 %v60_v49, %v59_v48  ;;  %v563_v53 = vpack.c.bf16 %v62_v52, %v61_v51  ;;  %v298_v61 = vld [vmem:[%s881_s5] sm:$0x3]  ;;  %s664_s5 = smov 64   ;;  %v346_v16 = vld [vmem:[%s882_s6 + $0x8] sm:$0xff]  ;;  %v347_v17 = vld [vmem:[%s882_s6 + $0x10] sm:$0xff] }
  0x14   :  { %578 = vmatprep.subr.bf16.mxu1 %v577_v42  ;;  %v307_v63 = vrot.slane %v298_v61, %v306_v62  ;;  %v303_v1 = vrot.slane %v298_v61, %v302_v0  ;;  %v345_v15 = vld [vmem:[%s882_s6] sm:$0xff]  ;;  %v348_v19 = vld [vmem:[%s882_s6 + $0x18] sm:$0xff]  ;;  %s666_s6 = smov [#allocation5]  }
  0x15   :  { %555 = vmatpush3.bf16.msra.mxu0 %v554_v38  ;;  %v582_v18 = vpack.c.bf16 %v346_v16, %v345_v15  ;;  %v585_v20 = vpack.c.bf16 %v348_v19, %v347_v17  ;;  %s455_s10 = sshll.u32 %s666_s6, 4  ;;  %s456_s10 = int_to_ptr.vmem [resolvable:$true] %s455_s10 }
  0x16   :  { %556 = vmatprep.subr.bf16.mxu0 %v659_v4  ;;  %s610_s11 = scalar_lea.vmem %s456_s10, 128  ;;  %p615_p1 = scmp.lt.s32.totalorder %s456_s10, %s456_s10 }
  0x17   :  { %580 = vmatpush1.bf16.msra.mxu1 %v579_v47  ;;  %p611_p0 = scmp.ne.s32.totalorder %s456_s10, %s610_s11  ;;  %p616_p2 = scmp.lt.s32.totalorder %s610_s11, %s610_s11 }
  0x18   :  { %581 = vmatprep.subr.bf16.mxu1 %v659_v4 }
  0x19   :  { %558 = vmatpush3.bf16.msra.mxu0 %v557_v46  ;;  %p617_p3 = por %p616_p2, %p615_p1 }
  0x1a   :  { %559 = vmatprep.subr.bf16.mxu0 %v659_v4 }
  0x1b   :  { %p618_p4 = pnand %p617_p3, %p611_p0 }
  0x1d   :  { %561 = vmatpush3.bf16.msra.mxu0 %v560_v50 }
  0x1e   :  { %562 = vmatprep.subr.bf16.mxu0 %v659_v4 }
  0x21   :  { %564 = vmatpush3.bf16.msra.mxu0 %v563_v53 }
  0x81   :  { %v43_v56 = vpop.permute.xlu0 %42 }
  0x82   :  { %vm44_vm2 = vcmp.eq.s32.totalorder %v43_v56, %v40_v55 }
  0x83   :  { %528 = vmatmul.mubr.msk.f32.vlgmr.msra.gmra.mrb[0].mxu0 %vm44_vm2, %v662_v57 }
 0x156   :  { %v129_v58 = vpop.f32.mrb[0].mxu0 }
 0x157   :  { %v529_v59 = vpop.f32.mrb[1].mxu0  ;;  %470 = vmatmul.mubr.msk.f32.vlgmr.msra.gmra.mrb[0].mxu1 %vm35_vm1, %v129_v58 }
 0x158   :  { %538 = vmatprep.mubr.msk.f32.mxu1 %vm660_vm0, %v661_v8  ;;  %583 = vmatpush3.bf16.msra.mxu1 %v582_v18 }
 0x159   :  { %584 = vmatprep.subr.bf16.mxu1 %v659_v4 }
 0x15c   :  { %586 = vmatpush3.bf16.msra.mxu1 %v585_v20 }
 0x22a   :  { %v293_v2 = vpop.f32.mrb[0].mxu1 }
 0x22b   :  { %v310_v3 = vadd.f32 %v303_v1, %v293_v2  ;;  %v295_v5 = vpop.f32.mrb[1].mxu1 }
 0x22c   :  { %v311_v6 = vadd.f32 %v307_v63, %v295_v5 }
 0x22d   :  { %319 = vrot.lane.b32.xlu0 %v310_v3, %s663_s23  ;;  %v471_v7 = vmul.f32 -1.442695, %v310_v3 }
 0x22f   :  { %600 = vpow2.f32 %v471_v7 }
 0x231   :  { %335 = vrot.lane.b32.xlu0 %v37_v45, %s663_s23 }
 0x239   :  { %v601_v9 = vpop.eup %600 }
 0x23a   :  { %v315_v8 = vadd.f32 1.0, %v601_v9 }
 0x23c   :  { %602 = vrcp.f32 %v315_v8 }
 0x246   :  { %v603_v10 = vpop.eup %602 }
 0x247   :  { %v329_v23 = vsub.f32 1.0, %v603_v10 }
 0x29f   :  { %v320_v11 = vpop.permute.xlu0 %319 }
 0x2a0   :  { %v322_v12 = vmul.f32 %v603_v10, %v320_v11 }
 0x2a2   :  { %324 = vrot.lane.b32.xlu1 %v322_v12, %s664_s5 }
 0x2a3   :  { %v336_v22 = vpop.permute.xlu0 %335 }
 0x2a4   :  { %v338_v25 = vmul.f32 %v603_v10, %v336_v22 }
 0x314   :  { %v325_v13 = vpop.permute.xlu1 %324 }
 0x315   :  { %v327_v14 = vadd.f32 %v325_v13, %v310_v3 }
 0x317   :  { %604 = vtanh.f32 %v327_v14 }
 0x321   :  { %v605_v21 = vpop.eup %604 }
 0x322   :  { %331 = vrot.lane.b32.xlu1 %v605_v21, %s665_s9 }
 0x394   :  { %v332_v24 = vpop.permute.xlu1 %331 }
 0x395   :  { %v334_v26 = vmul.f32 %v332_v24, %v329_v23 }
 0x397   :  { %v339_v27 = vadd.f32 %v338_v25, %v334_v26 }
 0x399   :  { %341 = vrot.lane.b32.xlu1 %v339_v27, %s665_s9 }
 0x40b   :  { %v342_v28 = vpop.permute.xlu1 %341 }
 0x40c   :  { %344 = vst.msk [vmem:[#allocation2] sm:$0xff] %vm35_vm1, %v342_v28  ;;  %438 = vst.msk [vmem:[#allocation5] sm:$0xff] %vm35_vm1, %v342_v28  ;;  %539 = vmatmul.mubr.msk.f32.vlgmr.msra.gmra.mrb[2].mxu1 %vm35_vm1, %v342_v28 }
 0x4df   :  { %v417_v29 = vpop.f32.mrb[2].mxu1 }
 0x4e0   :  { %v421_v4 = vadd.f32 %v417_v29, %v311_v6  ;;  %v540_v30 = vpop.f32.mrb[3].mxu1 }
 0x4e2   :  { %422 = vmax.xlane.f32.xlu0 %v421_v4 }
 0x56f   :  { %v423_v31 = vpop.xlane.xlu0 %422 }
 0x570   :  { %v424_v32 = vsub.f32 %v421_v4, %v423_v31 }
 0x572   :  { %v425_v33 = vmul.f32 1.442695, %v424_v32 }
 0x574   :  { %606 = vpow2.f32 %v425_v33 }
 0x57e   :  { %v607_v34 = vpop.eup %606 }
 0x57f   :  { %427 = vadd.xlane.f32.xlu1 %v607_v34 }
 0x580   :  { %621 = shalt.err (!%p618_p4)
}
 0x581   :  { %s622_s0 = scalar_lea.hbm %s884_s8, 128 }
 0x582   :  { %p623_p5 = scmp.ne.s32.totalorder %s884_s8, %s622_s0  ;;  %p626_p6 = scmp.lt.u32.totalorder %s622_s0, %s884_s8 }
 0x584   :  { %p628_p7 = pnand %p626_p6, %p623_p5 }
 0x586   :  { %631 = shalt.err (!%p628_p7)
}
 0x587   :  { %458 = dma.vmem_to_hbm [thread:$0]  %s456_s10, 128, %s884_s8, [#allocation6]  }
 0x588   :  { %s667_s3 = smov [#allocation3]  }
 0x589   :  { %s445_s20 = sshll.u32 %s667_s3, 4  ;;  %s446_s20 = int_to_ptr.vmem [resolvable:$true] %s445_s20 }
 0x58a   :  { %s632_s4 = scalar_lea.vmem %s446_s20, 128  ;;  %p637_p9 = scmp.lt.s32.totalorder %s446_s20, %s446_s20 }
 0x58b   :  { %p633_p8 = scmp.ne.s32.totalorder %s446_s20, %s632_s4  ;;  %p638_p10 = scmp.lt.s32.totalorder %s632_s4, %s632_s4 }
 0x58d   :  { %p639_p11 = por %p638_p10, %p637_p9 }
 0x58f   :  { %p640_p12 = pnand %p639_p11, %p633_p8 }
 0x60c   :  { %v428_v35 = vpop.xlane.xlu1 %427 }
 0x60d   :  { %608 = vrcp.f32 %v428_v35 }
 0x617   :  { %v609_v36 = vpop.eup %608 }
 0x618   :  { %v430_v37 = vmul.f32 %v609_v36, %v428_v35 }
 0x61a   :  { %v431_v38 = vsub.f32 2.0, %v430_v37 }
 0x61c   :  { %v432_v39 = vmul.f32 %v609_v36, %v431_v38 }
 0x61e   :  { %v433_v40 = vmul.f32 %v607_v34, %v432_v39 }
 0x620   :  { %434 = vst [vmem:[#allocation3] sm:$0xff] %v433_v40 }
 0x621   :  { %643 = shalt.err (!%p640_p12)
}
 0x622   :  { %s644_s2 = scalar_lea.hbm %s883_s7, 128 }
 0x623   :  { %p645_p13 = scmp.ne.s32.totalorder %s883_s7, %s644_s2  ;;  %p648_p0 = scmp.lt.u32.totalorder %s644_s2, %s883_s7 }
 0x625   :  { %p650_p1 = pnand %p648_p0, %p645_p13 }
 0x627   :  { %653 = shalt.err (!%p650_p1)
}
 0x628   :  { %448 = dma.vmem_to_hbm [thread:$0]  %s446_s20, 128, %s883_s7, [#allocation4]  }
 0x629   :  { %654 = dma.done.wait [#allocation4], 128  }
 0x62a   :  { %655 = vsyncadd [#allocation4], 4294967168 }
 0x62b   :  { %656 = dma.done.wait [#allocation6], 128  }
 0x62c   :  { %657 = vsyncadd [#allocation6], 4294967168 }
 0x62d   :  { %465 = vsyncpa [#allocation4], 1 }
 0x62e   :  { %466 = vsyncpa [#allocation6], 1 }

</bundles_post_ra>
